<compile_context>
chip_gen: v6e
topology: v6e:2x2x1
jax: 0.10.0
libtpu: 0.0.40
codegen_flags: <defaults>
</compile_context>

<pallas_src>
import jax
import jax.numpy as jnp
from jax.experimental import pallas as pl
from jax.experimental.pallas import tpu as pltpu


# Below this many bytes the residual add is launch-overhead dominated: skip Pallas.
_SMALL_BYPASS_BYTES = 2 * 1024 * 1024


def _add_kernel(a_ref, b_ref, o_ref):
    # Cast-per-tile (pure elementwise, safe under masked edge blocks) then add.
    o_ref[...] = a_ref[...].astype(o_ref.dtype) + b_ref[...].astype(o_ref.dtype)


def _vmem_budget_bytes():
    """Generation-aware scoped-VMEM budget for this call (<= 32 MiB everywhere)."""
    vmem = 64 * 1024 * 1024  # conservative default: v7x per-TensorCore VMEM
    try:
        info = pltpu.get_tpu_info()
        vmem = int(getattr(info, "vmem_capacity_bytes", vmem))
    except Exception:
        pass
    return min(32 * 1024 * 1024, max(vmem // 2, 8 * 1024 * 1024))


def _pick_layout(total, itemsizes, vmem_limit):
    """Choose (lanes, main, rows, tr) for a lane-dense [rows, lanes] slab.

    `main` is the largest lanes-aligned prefix of the flat arrays; any tail
    (< lanes elements) is added by plain XLA in the wrapper (no padded copies).
    """
    lanes = None
    for cand in (4096, 2048, 1024, 512, 256, 128):
        if total % cand == 0:
            lanes = cand
            break
    if lanes is None:
        lanes = 128  # ragged numel: minimize the XLA-handled tail (< 128 elems)

    main = (total // lanes) * lanes
    rows = main // lanes
    if rows == 0:
        return lanes, 0, 0, 0

    # Per-array block budget: 3 arrays x 2 pipeline buffers must fit the scoped
    # VMEM limit with headroom -> block_bytes ~= vmem_limit / 8 (~4 MiB @ 32 MiB).
    max_item = max(itemsizes)
    block_bytes = max(8 * lanes * max_item, vmem_limit // 8)
    tr = block_bytes // (lanes * max_item)

    # Packed-sublane quantum: 8 for 32-bit, 16 for bf16/f16, 32 for 8-bit dtypes.
    q = max(32 // it for it in itemsizes)

    if tr >= rows:
        if rows >= 2 * q:
            # Keep at least 2 grid steps so the axis can shard across both
            # TensorCores on v7x (and megacore on v5e/v6e).
            half = (rows + 1) // 2
            tr = ((half + q - 1) // q) * q
        else:
            tr = rows  # single full-extent block (always a legal block shape)
    else:
        tr = max(q, (tr // q) * q)
    return lanes, main, rows, tr


def shortcut_forward(x0, x1, *, min_pallas_bytes=_SMALL_BYPASS_BYTES):
    """Pallas equivalent of Shortcut.forward([x0, x1]) == x0 + x1."""
    assert x0.shape == x1.shape, "Shortcut expects equal shapes"
    # TODO(synk): jnp.promote_types matches torch.result_type for float combos;
    # integer+float mixes may promote differently in torch.
    out_dtype = jnp.promote_types(x0.dtype, x1.dtype)
    orig_shape = x0.shape
    total = int(x0.size)

    itemsizes = (
        jnp.dtype(x0.dtype).itemsize,
        jnp.dtype(x1.dtype).itemsize,
        jnp.dtype(out_dtype).itemsize,
    )

    # Small activations: XLA's fused add beats custom-call + pipeline overhead.
    if total * max(itemsizes) < min_pallas_bytes:
        return (x0 + x1).astype(out_dtype).reshape(orig_shape)

    vmem_limit = _vmem_budget_bytes()
    lanes, main, rows, tr = _pick_layout(total, itemsizes, vmem_limit)

    if rows == 0:  # fewer than 128 elements: nothing for the kernel to do
        return (x0 + x1).astype(out_dtype).reshape(orig_shape)

    a = jnp.reshape(x0, (-1,))
    b = jnp.reshape(x1, (-1,))
    a2 = a[:main].reshape(rows, lanes)
    b2 = b[:main].reshape(rows, lanes)

    grid = (pl.cdiv(rows, tr),)  # bounded tiles; Pallas masks the edge block

    out2 = pl.pallas_call(
        _add_kernel,
        out_shape=jax.ShapeDtypeStruct((rows, lanes), out_dtype),
        grid=grid,
        in_specs=[
            pl.BlockSpec((tr, lanes), lambda i: (i, 0)),
            pl.BlockSpec((tr, lanes), lambda i: (i, 0)),
        ],
        out_specs=pl.BlockSpec((tr, lanes), lambda i: (i, 0)),
        compiler_params=pltpu.CompilerParams(
            dimension_semantics=(pltpu.PARALLEL,),
            vmem_limit_bytes=vmem_limit,
        ),
        cost_estimate=pl.CostEstimate(
            flops=main,
            transcendentals=0,
            bytes_accessed=main * sum(itemsizes),
        ),
    )(a2, b2)

    out_flat = out2.reshape(-1)
    if main < total:
        # Ragged tail (< 128 elems): one tiny XLA add, no padded HBM round trip.
        tail = a[main:].astype(out_dtype) + b[main:].astype(out_dtype)
        out_flat = jnp.concatenate([out_flat, tail])
    return out_flat.reshape(orig_shape)


if __name__ == "__main__":
    key = jax.random.PRNGKey(0)
    k0, k1, k2, k3, k4, k5 = jax.random.split(key, 6)

    # 1) Primary case (module-sized input): small NCHW tensors -> bypass path.
    shape = (2, 4, 16, 16)
    x0 = jax.random.normal(k0, shape, dtype=jnp.float32)
    x1 = jax.random.normal(k1, shape, dtype=jnp.float32)
    out = jax.block_until_ready(shortcut_forward(x0, x1))
    assert out.shape == shape
    assert jnp.allclose(out, x0 + x1, atol=1e-6, rtol=1e-6)

    # 2) Same small tensors, forced through the Pallas kernel (single block).
    out_forced = jax.block_until_ready(shortcut_forward(x0, x1, min_pallas_bytes=0))
    assert jnp.allclose(out_forced, x0 + x1, atol=1e-6, rtol=1e-6)

    # 3) Mixed dtypes (bf16 residual + f32), in-kernel promotion, forced Pallas.
    xb = x0.astype(jnp.bfloat16)
    out_mixed = jax.block_until_ready(shortcut_forward(xb, x1, min_pallas_bytes=0))
    assert out_mixed.dtype == jnp.float32
    assert jnp.allclose(out_mixed, xb.astype(jnp.float32) + x1, atol=1e-2, rtol=1e-2)

    # 4) Ragged numel (not a multiple of 128): prefix slab + XLA tail, forced Pallas.
    shape2 = (2, 3, 5, 7)
    y0 = jax.random.normal(k2, shape2, dtype=jnp.float32)
    y1 = jax.random.normal(k3, shape2, dtype=jnp.float32)
    out_ragged = jax.block_until_ready(shortcut_forward(y0, y1, min_pallas_bytes=0))
    assert jnp.allclose(out_ragged, y0 + y1, atol=1e-6, rtol=1e-6)

    # 5) Streaming path above the bypass cutoff (multi-step pipelined grid).
    shape3 = (4, 32, 64, 64)  # 2 MiB per f32 tensor
    z0 = jax.random.normal(k4, shape3, dtype=jnp.float32)
    z1 = jax.random.normal(k5, shape3, dtype=jnp.float32)
    out_big = jax.block_until_ready(shortcut_forward(z0, z1))
    assert jnp.allclose(out_big, z0 + z1, atol=1e-6, rtol=1e-6)

    print("KERNEL_OK")
</pallas_src>

<mosaic_0001>
module attributes {stable_mosaic.version = 11 : i64} {
  func.func @_add_kernel(%arg0: i32, %arg1: memref<1x2048xf32, #tpu.memory_space<vmem>>, %arg2: memref<1x2048xf32, #tpu.memory_space<vmem>>, %arg3: memref<1x2048xf32, #tpu.memory_space<vmem>>) attributes {dimension_semantics = [#tpu.dimension_semantics<parallel>], iteration_bounds = array<i64: 1>, scalar_prefetch = 0 : i64, scratch_operands = 0 : i64, tpu.core_type = #tpu.core_type<tc>, window_params = [{transform_indices = @transform_0, window_bounds = array<i64: 1, 2048>}, {transform_indices = @transform_1, window_bounds = array<i64: 1, 2048>}, {transform_indices = @transform_2, window_bounds = array<i64: 1, 2048>}]} {
    %c0 = arith.constant 0 : index
    %c0_0 = arith.constant 0 : index
    %0 = vector.load %arg1[%c0, %c0_0] : memref<1x2048xf32, #tpu.memory_space<vmem>>, vector<1x2048xf32>
    %c0_1 = arith.constant 0 : index
    %c0_2 = arith.constant 0 : index
    %1 = vector.load %arg2[%c0_1, %c0_2] : memref<1x2048xf32, #tpu.memory_space<vmem>>, vector<1x2048xf32>
    %2 = arith.addf %0, %1 : vector<1x2048xf32>
    %c0_3 = arith.constant 0 : index
    %c0_4 = arith.constant 0 : index
    %3 = vector.load %arg3[%c0_3, %c0_4] : memref<1x2048xf32, #tpu.memory_space<vmem>>, vector<1x2048xf32>
    tpu.vector_store %arg3[%c0_3, %c0_4], %2 {strides = array<i32>} : memref<1x2048xf32, #tpu.memory_space<vmem>>, vector<1x2048xf32>,
    return
  }
  func.func @transform_0(%arg0: i32) -> (i32, i32) {
    %c0_i32 = arith.constant 0 : i32
    %c0_i32_0 = arith.constant 0 : i32
    return %arg0, %c0_i32 : i32, i32
  }
  func.func @transform_1(%arg0: i32) -> (i32, i32) {
    %c0_i32 = arith.constant 0 : i32
    %c0_i32_0 = arith.constant 0 : i32
    return %arg0, %c0_i32 : i32, i32
  }
  func.func @transform_2(%arg0: i32) -> (i32, i32) {
    %c0_i32 = arith.constant 0 : i32
    %c0_i32_0 = arith.constant 0 : i32
    return %arg0, %c0_i32 : i32, i32
  }
}

</mosaic_0001>

<bundles_post_ra>
// kernel: tpu_custom_call.1
= control target key start
LH: loop header
LB: loop body
LE: loop exit
PB: predicated region body
PF: predicated region fallthrough
CT: control target
= control target key end

     0   :  { %7 = vsyncpa [#allocation3], 0  ;;  %s156_s0 = inlined_call_operand.hbm [shape: f32[1,2048], index: 0, kind: input, shape index: {}]   ;;  %s157_s1 = inlined_call_operand.hbm [shape: f32[1,2048], index: 1, kind: input, shape index: {}]   ;;  %s158_s2 = inlined_call_operand.hbm [shape: f32[1,2048], index: 2, kind: output, shape index: {}]  }
   0x1   :  { %8 = vsyncpa [#allocation6], 0 }
   0x2   :  { %9 = vsyncpa [#allocation4], 0  ;;  %s129_s9 = smov [#allocation2]   ;;  %s130_s11 = smov [#allocation5]  }
   0x3   :  { %s16_s10 = sshll.u32 %s129_s9, 4  ;;  %s26_s12 = sshll.u32 %s130_s11, 4  ;;  %s17_s10 = int_to_ptr.vmem [resolvable:$true] %s16_s10  ;;  %s27_s12 = int_to_ptr.vmem [resolvable:$true] %s26_s12 }
   0x4   :  { %s71_s13 = scalar_lea.vmem %s17_s10, 256  ;;  %p76_p1 = scmp.lt.s32.totalorder %s17_s10, %s17_s10 }
   0x5   :  { %p72_p0 = scmp.ne.s32.totalorder %s17_s10, %s71_s13  ;;  %p77_p2 = scmp.lt.s32.totalorder %s71_s13, %s71_s13 }
   0x7   :  { %p78_p3 = por %p77_p2, %p76_p1 }
   0x9   :  { %p79_p4 = pnand %p78_p3, %p72_p0 }
   0xb   :  { %82 = shalt.err (!%p79_p4)
}
   0xc   :  { %19 = dma.hbm_to_vmem [thread:$0]  %s156_s0, 256, %s17_s10, [#allocation3]  }
   0xd   :  { %s91_s16 = scalar_lea.vmem %s27_s12, 256  ;;  %p96_p6 = scmp.lt.s32.totalorder %s27_s12, %s27_s12 }
   0xe   :  { %p92_p5 = scmp.ne.s32.totalorder %s27_s12, %s91_s16  ;;  %p97_p7 = scmp.lt.s32.totalorder %s91_s16, %s91_s16 }
  0x10   :  { %p98_p8 = por %p97_p7, %p96_p6 }
  0x12   :  { %p99_p9 = pnand %p98_p8, %p92_p5 }
  0x14   :  { %102 = shalt.err (!%p99_p9)
}
  0x15   :  { %29 = dma.hbm_to_vmem [thread:$0]  %s157_s1, 256, %s27_s12, [#allocation6]  }
  0x16   :  { %123 = dma.done.wait [#allocation3], 256  }
  0x17   :  { %124 = vsyncadd [#allocation3], 4294967040 }
  0x18   :  { %125 = dma.done.wait [#allocation6], 256  }
  0x19   :  { %126 = vsyncadd [#allocation6], 4294967040  ;;  %s131_s19 = smov [#allocation7]   ;;  %v36_v0 = vld [vmem:[#allocation2] sm:$0xff]  ;;  %v38_v1 = vld [vmem:[#allocation5] sm:$0xff] }
  0x1a   :  { %s50_s20 = sshll.u32 %s131_s19, 4  ;;  %v37_v2 = vld [vmem:[#allocation2 + $0x8] sm:$0xff]  ;;  %v40_v3 = vadd.f32 %v38_v1, %v36_v0  ;;  %v39_v4 = vld [vmem:[#allocation5 + $0x8] sm:$0xff]  ;;  %s51_s20 = int_to_ptr.vmem [resolvable:$true] %s50_s20 }
  0x1b   :  { %v41_v5 = vadd.f32 %v39_v4, %v37_v2  ;;  %s103_s0 = scalar_lea.vmem %s51_s20, 256  ;;  %p108_p11 = scmp.lt.s32.totalorder %s51_s20, %s51_s20 }
  0x1c   :  { %42 = vst [vmem:[#allocation7] sm:$0xff] %v40_v3  ;;  %p104_p10 = scmp.ne.s32.totalorder %s51_s20, %s103_s0  ;;  %p109_p12 = scmp.lt.s32.totalorder %s103_s0, %s103_s0 }
  0x1d   :  { %43 = vst [vmem:[#allocation7 + $0x8] sm:$0xff] %v41_v5 }
  0x1e   :  { %p110_p13 = por %p109_p12, %p108_p11 }
  0x20   :  { %p111_p0 = pnand %p110_p13, %p104_p10 }
  0x22   :  { %114 = shalt.err (!%p111_p0)
}
  0x23   :  { %53 = dma.vmem_to_hbm [thread:$0]  %s51_s20, 256, %s158_s2, [#allocation4]  }
  0x24   :  { %127 = dma.done.wait [#allocation4], 256  }
  0x25   :  { %128 = vsyncadd [#allocation4], 4294967040 }
  0x26   :  { %57 = vsyncpa [#allocation3], 1 }
  0x27   :  { %58 = vsyncpa [#allocation6], 1 }
  0x28   :  { %59 = vsyncpa [#allocation4], 1 }

</bundles_post_ra>
